<compile_context>
chip_gen: v7x
topology: tpu7x:2x2x1
jax: 0.10.0
libtpu: 0.0.40
codegen_flags: <defaults>
</compile_context>

<pallas_src>
import functools

import jax
import jax.numpy as jnp
from jax import lax
from jax.experimental import pallas as pl
from jax.experimental.pallas import tpu as pltpu  # noqa: F401  (TPU tuning hooks)


def rnn_kernel(seq_ref, m_ref, whh_ref, bias_ref, wfc_ref, bfc_ref, out_ref,
               *, seq_len, batch):
    tb = seq_len * batch
    vocab = m_ref.shape[0]
    hidden = whh_ref.shape[1]

    # ---- Phase 1+2 (fused): embedding gather + input projection in ONE matmul.
    # M = emb_table @ W_ih^T was folded in the wrapper, so onehot @ M is an
    # exact (0/1-weighted) row gather of the already-projected embeddings.
    # The folded bias (b_ih + b_hh) is added once.  P never touches VMEM
    # scratch; it lives in vregs until consumed by the recurrence.
    ids = seq_ref[...]                                            # (T*B, 1) int32
    lane_ids = lax.broadcasted_iota(jnp.int32, (tb, vocab), 1)    # (T*B, V)
    onehot = (lane_ids == ids).astype(jnp.float32)                # (T*B, V)
    p = jnp.dot(onehot, m_ref[...],
                preferred_element_type=jnp.float32) + bias_ref[...]   # (T*B, H)

    # ---- Phase 3: serial tanh recurrence, fully unrolled at trace time.
    # Static Python unroll over T=8 steps keeps every per-step slice of P a
    # compile-time-constant, 8-row-aligned vreg selection (the intent of the
    # "drop p_scratch" optimization) while emitting the exact same fully
    # unrolled instruction chain a fori_loop(unroll=True) would.  W_hh is read
    # once so its MXU weight push is loop-invariant.
    whh = whh_ref[...]                                            # (H, H)
    h = jnp.zeros((batch, hidden), jnp.float32)
    for t in range(seq_len):
        p_t = p[t * batch:(t + 1) * batch, :]                     # (B, H) static
        h = jnp.tanh(p_t + jnp.dot(h, whh,
                                   preferred_element_type=jnp.float32))

    # ---- Phase 4: fc + numerically stable log_softmax.
    # (B, C) = (8, 128) f32 -> one full (8,128) tile, unmasked lane-dense store.
    logits = jnp.dot(h, wfc_ref[...],
                     preferred_element_type=jnp.float32) + bfc_ref[...]
    mmax = jnp.max(logits, axis=-1, keepdims=True)
    lse = mmax + jnp.log(jnp.sum(jnp.exp(logits - mmax), axis=-1, keepdims=True))
    out_ref[...] = (logits - lse).astype(out_ref.dtype)


def simple_rnn_forward(seq, emb_table, wih_t, whh_t, bih, bhh, wfc_t, bfc):
    T, B = seq.shape
    H = whh_t.shape[1]
    C = wfc_t.shape[1]

    seq2d = seq.reshape(T * B, 1).astype(jnp.int32)        # time-major flatten

    # Fold the embedding table into the input projection:  M = Emb @ W_ih^T.
    # onehot @ M inside the kernel then equals (Emb[ids] @ W_ih^T) exactly.
    # HIGHEST precision keeps the fold f32-exact; amortized across calls when
    # the wrapper is jitted / weights are reused.
    m = jnp.dot(emb_table, wih_t, precision=lax.Precision.HIGHEST)   # (V, H)
    bias = (bih + bhh).reshape(1, H)                       # fold the two biases

    kernel = functools.partial(rnn_kernel, seq_len=T, batch=B)

    out = pl.pallas_call(
        kernel,
        out_shape=jax.ShapeDtypeStruct((B, C), jnp.float32),
        # No grid, no scratch: every operand is a whole-array VMEM resident
        # (< 100 KiB total, far inside even v7x's 64 MiB VMEM / 32 MiB scoped
        # default), and the hoisted projection P stays in vregs.
    )(seq2d, m, whh_t, bias, wfc_t, bfc)
    return out


if __name__ == "__main__":
    # Small, deterministic synthetic setup consistent with the module:
    # n_vocab = n_classes (fc maps hidden -> vocab size).
    seq_len, batch = 8, 8
    n_vocab = 128          # = n_classes
    emb_dim = 32
    hidden_dim = 32

    key = jax.random.PRNGKey(0)
    k_seq, k_emb, k_wih, k_whh, k_bih, k_bhh, k_wfc, k_bfc = jax.random.split(key, 8)

    seq = jax.random.randint(k_seq, (seq_len, batch), 0, n_vocab, dtype=jnp.int32)

    # Deterministic "pretrained_vec" stand-in and RNN / fc parameters.
    emb_table = 0.1 * jax.random.normal(k_emb, (n_vocab, emb_dim), jnp.float32)
    wih_t = 0.1 * jax.random.normal(k_wih, (emb_dim, hidden_dim), jnp.float32)
    whh_t = 0.1 * jax.random.normal(k_whh, (hidden_dim, hidden_dim), jnp.float32)
    bih = 0.1 * jax.random.normal(k_bih, (1, hidden_dim), jnp.float32)
    bhh = 0.1 * jax.random.normal(k_bhh, (1, hidden_dim), jnp.float32)
    wfc_t = 0.1 * jax.random.normal(k_wfc, (hidden_dim, n_vocab), jnp.float32)
    bfc = 0.1 * jax.random.normal(k_bfc, (1, n_vocab), jnp.float32)

    fwd = jax.jit(simple_rnn_forward)
    out = fwd(seq, emb_table, wih_t, whh_t, bih, bhh, wfc_t, bfc)
    out = jax.block_until_ready(out)

    assert out.shape == (batch, n_vocab), out.shape
    # log_softmax rows should exp-sum to 1.
    assert jnp.allclose(jnp.sum(jnp.exp(out), axis=-1), 1.0, atol=1e-4)

    # Cross-check against a pure-JAX reference of the same recurrence, computed
    # at HIGHEST matmul precision (true f32).  Tolerance leaves headroom for a
    # reduced-precision (bf16-pass) MXU lowering of the in-kernel f32 dots while
    # remaining far below the output scale (log-probs ~ -4.9).
    hdot = functools.partial(jnp.dot, precision=lax.Precision.HIGHEST)

    def ref_fwd():
        emb = jnp.take(emb_table, seq, axis=0)             # (T, B, E)
        h = jnp.zeros((batch, hidden_dim), jnp.float32)
        for t in range(seq_len):
            h = jnp.tanh(hdot(emb[t], wih_t) + bih + hdot(h, whh_t) + bhh)
        logits = hdot(h, wfc_t) + bfc
        return jax.nn.log_softmax(logits, axis=-1)

    ref = ref_fwd()
    assert jnp.allclose(out, ref, atol=5e-3, rtol=1e-5), float(
        jnp.max(jnp.abs(out - ref)))

    print("KERNEL_OK")
</pallas_src>

<mosaic_0001>
module attributes {stable_mosaic.version = 11 : i64} {
  func.func @rnn_kernel(%arg0: memref<64x1xi32, #tpu.memory_space<vmem>>, %arg1: memref<128x32xf32, #tpu.memory_space<vmem>>, %arg2: memref<32x32xf32, #tpu.memory_space<vmem>>, %arg3: memref<1x32xf32, #tpu.memory_space<vmem>>, %arg4: memref<32x128xf32, #tpu.memory_space<vmem>>, %arg5: memref<1x128xf32, #tpu.memory_space<vmem>>, %arg6: memref<8x128xf32, #tpu.memory_space<vmem>>) attributes {dimension_semantics = [], scalar_prefetch = 0 : i64, scratch_operands = 0 : i64, tpu.core_type = #tpu.core_type<tc>} {
    %c0 = arith.constant 0 : index
    %c0_0 = arith.constant 0 : index
    %0 = vector.load %arg0[%c0, %c0_0] : memref<64x1xi32, #tpu.memory_space<vmem>>, vector<64x1xi32>
    %1 = tpu.iota {dimensions = array<i32: 1>} : vector<64x128xi32>
    %2 = vector.broadcast %0 : vector<64x1xi32> to vector<64x128xi32>
    %3 = arith.cmpi eq, %1, %2 : vector<64x128xi32>
    %4 = arith.extui %3 : vector<64x128xi1> to vector<64x128xi32>
    %5 = arith.sitofp %4 : vector<64x128xi32> to vector<64x128xf32>
    %c0_1 = arith.constant 0 : index
    %c0_2 = arith.constant 0 : index
    %6 = vector.load %arg1[%c0_1, %c0_2] : memref<128x32xf32, #tpu.memory_space<vmem>>, vector<128x32xf32>
    %cst = arith.constant dense<0.000000e+00> : vector<64x32xf32>
    %7 = tpu.matmul %5, %6, %cst {dimension_numbers = #tpu.dot_dimension_numbers<[1], [0], [0], [1], [0, 0, 1, 1], [], []>} : vector<64x128xf32>, vector<128x32xf32>, vector<64x32xf32> -> vector<64x32xf32>
    %c0_3 = arith.constant 0 : index
    %c0_4 = arith.constant 0 : index
    %8 = vector.load %arg3[%c0_3, %c0_4] : memref<1x32xf32, #tpu.memory_space<vmem>>, vector<1x32xf32>
    %9 = vector.broadcast %8 : vector<1x32xf32> to vector<64x32xf32>
    %10 = arith.addf %7, %9 : vector<64x32xf32>
    %c0_5 = arith.constant 0 : index
    %c0_6 = arith.constant 0 : index
    %11 = vector.load %arg2[%c0_5, %c0_6] : memref<32x32xf32, #tpu.memory_space<vmem>>, vector<32x32xf32>
    %cst_7 = arith.constant 0.000000e+00 : f32
    %12 = vector.broadcast %cst_7 : f32 to vector<8x32xf32>
    %13 = vector.extract_strided_slice %10 {offsets = [0, 0], sizes = [8, 32], strides = [1, 1]} : vector<64x32xf32> to vector<8x32xf32>
    %cst_8 = arith.constant dense<0.000000e+00> : vector<8x32xf32>
    %14 = tpu.matmul %12, %11, %cst_8 {dimension_numbers = #tpu.dot_dimension_numbers<[1], [0], [0], [1], [0, 0, 1, 1], [], []>} : vector<8x32xf32>, vector<32x32xf32>, vector<8x32xf32> -> vector<8x32xf32>
    %15 = arith.addf %13, %14 : vector<8x32xf32>
    %16 = math.tanh %15 : vector<8x32xf32>
    %17 = vector.extract_strided_slice %10 {offsets = [8, 0], sizes = [8, 32], strides = [1, 1]} : vector<64x32xf32> to vector<8x32xf32>
    %cst_9 = arith.constant dense<0.000000e+00> : vector<8x32xf32>
    %18 = tpu.matmul %16, %11, %cst_9 {dimension_numbers = #tpu.dot_dimension_numbers<[1], [0], [0], [1], [0, 0, 1, 1], [], []>} : vector<8x32xf32>, vector<32x32xf32>, vector<8x32xf32> -> vector<8x32xf32>
    %19 = arith.addf %17, %18 : vector<8x32xf32>
    %20 = math.tanh %19 : vector<8x32xf32>
    %21 = vector.extract_strided_slice %10 {offsets = [16, 0], sizes = [8, 32], strides = [1, 1]} : vector<64x32xf32> to vector<8x32xf32>
    %cst_10 = arith.constant dense<0.000000e+00> : vector<8x32xf32>
    %22 = tpu.matmul %20, %11, %cst_10 {dimension_numbers = #tpu.dot_dimension_numbers<[1], [0], [0], [1], [0, 0, 1, 1], [], []>} : vector<8x32xf32>, vector<32x32xf32>, vector<8x32xf32> -> vector<8x32xf32>
    %23 = arith.addf %21, %22 : vector<8x32xf32>
    %24 = math.tanh %23 : vector<8x32xf32>
    %25 = vector.extract_strided_slice %10 {offsets = [24, 0], sizes = [8, 32], strides = [1, 1]} : vector<64x32xf32> to vector<8x32xf32>
    %cst_11 = arith.constant dense<0.000000e+00> : vector<8x32xf32>
    %26 = tpu.matmul %24, %11, %cst_11 {dimension_numbers = #tpu.dot_dimension_numbers<[1], [0], [0], [1], [0, 0, 1, 1], [], []>} : vector<8x32xf32>, vector<32x32xf32>, vector<8x32xf32> -> vector<8x32xf32>
    %27 = arith.addf %25, %26 : vector<8x32xf32>
    %28 = math.tanh %27 : vector<8x32xf32>
    %29 = vector.extract_strided_slice %10 {offsets = [32, 0], sizes = [8, 32], strides = [1, 1]} : vector<64x32xf32> to vector<8x32xf32>
    %cst_12 = arith.constant dense<0.000000e+00> : vector<8x32xf32>
    %30 = tpu.matmul %28, %11, %cst_12 {dimension_numbers = #tpu.dot_dimension_numbers<[1], [0], [0], [1], [0, 0, 1, 1], [], []>} : vector<8x32xf32>, vector<32x32xf32>, vector<8x32xf32> -> vector<8x32xf32>
    %31 = arith.addf %29, %30 : vector<8x32xf32>
    %32 = math.tanh %31 : vector<8x32xf32>
    %33 = vector.extract_strided_slice %10 {offsets = [40, 0], sizes = [8, 32], strides = [1, 1]} : vector<64x32xf32> to vector<8x32xf32>
    %cst_13 = arith.constant dense<0.000000e+00> : vector<8x32xf32>
    %34 = tpu.matmul %32, %11, %cst_13 {dimension_numbers = #tpu.dot_dimension_numbers<[1], [0], [0], [1], [0, 0, 1, 1], [], []>} : vector<8x32xf32>, vector<32x32xf32>, vector<8x32xf32> -> vector<8x32xf32>
    %35 = arith.addf %33, %34 : vector<8x32xf32>
    %36 = math.tanh %35 : vector<8x32xf32>
    %37 = vector.extract_strided_slice %10 {offsets = [48, 0], sizes = [8, 32], strides = [1, 1]} : vector<64x32xf32> to vector<8x32xf32>
    %cst_14 = arith.constant dense<0.000000e+00> : vector<8x32xf32>
    %38 = tpu.matmul %36, %11, %cst_14 {dimension_numbers = #tpu.dot_dimension_numbers<[1], [0], [0], [1], [0, 0, 1, 1], [], []>} : vector<8x32xf32>, vector<32x32xf32>, vector<8x32xf32> -> vector<8x32xf32>
    %39 = arith.addf %37, %38 : vector<8x32xf32>
    %40 = math.tanh %39 : vector<8x32xf32>
    %41 = vector.extract_strided_slice %10 {offsets = [56, 0], sizes = [8, 32], strides = [1, 1]} : vector<64x32xf32> to vector<8x32xf32>
    %cst_15 = arith.constant dense<0.000000e+00> : vector<8x32xf32>
    %42 = tpu.matmul %40, %11, %cst_15 {dimension_numbers = #tpu.dot_dimension_numbers<[1], [0], [0], [1], [0, 0, 1, 1], [], []>} : vector<8x32xf32>, vector<32x32xf32>, vector<8x32xf32> -> vector<8x32xf32>
    %43 = arith.addf %41, %42 : vector<8x32xf32>
    %44 = math.tanh %43 : vector<8x32xf32>
    %c0_16 = arith.constant 0 : index
    %c0_17 = arith.constant 0 : index
    %45 = vector.load %arg4[%c0_16, %c0_17] : memref<32x128xf32, #tpu.memory_space<vmem>>, vector<32x128xf32>
    %cst_18 = arith.constant dense<0.000000e+00> : vector<8x128xf32>
    %46 = tpu.matmul %44, %45, %cst_18 {dimension_numbers = #tpu.dot_dimension_numbers<[1], [0], [0], [1], [0, 0, 1, 1], [], []>} : vector<8x32xf32>, vector<32x128xf32>, vector<8x128xf32> -> vector<8x128xf32>
    %c0_19 = arith.constant 0 : index
    %c0_20 = arith.constant 0 : index
    %47 = vector.load %arg5[%c0_19, %c0_20] : memref<1x128xf32, #tpu.memory_space<vmem>>, vector<1x128xf32>
    %48 = vector.broadcast %47 : vector<1x128xf32> to vector<8x128xf32>
    %49 = arith.addf %46, %48 : vector<8x128xf32>
    %cst_21 = arith.constant dense<0xFF800000> : vector<8xf32>
    %50 = vector.multi_reduction <maximumf>, %49, %cst_21 [1] : vector<8x128xf32> to vector<8xf32>
    %51 = vector.shape_cast %50 : vector<8xf32> to vector<8x1xf32>
    %52 = vector.broadcast %51 : vector<8x1xf32> to vector<8x128xf32>
    %53 = arith.subf %49, %52 : vector<8x128xf32>
    %54 = math.exp %53 : vector<8x128xf32>
    %cst_22 = arith.constant dense<0.000000e+00> : vector<8xf32>
    %55 = vector.multi_reduction <add>, %54, %cst_22 [1] : vector<8x128xf32> to vector<8xf32>
    %56 = vector.shape_cast %55 : vector<8xf32> to vector<8x1xf32>
    %57 = math.log %56 : vector<8x1xf32>
    %58 = arith.addf %51, %57 : vector<8x1xf32>
    %59 = vector.broadcast %58 : vector<8x1xf32> to vector<8x128xf32>
    %60 = arith.subf %49, %59 : vector<8x128xf32>
    %c0_23 = arith.constant 0 : index
    %c0_24 = arith.constant 0 : index
    %61 = vector.load %arg6[%c0_23, %c0_24] : memref<8x128xf32, #tpu.memory_space<vmem>>, vector<8x128xf32>
    tpu.vector_store %arg6[%c0_23, %c0_24], %60 {strides = array<i32>} : memref<8x128xf32, #tpu.memory_space<vmem>>, vector<8x128xf32>,
    return
  }
}

</mosaic_0001>

<bundles_post_ra>
// kernel: simple_rnn_forward.1
= control target key start
LH: loop header
LB: loop body
LE: loop exit
PB: predicated region body
PF: predicated region fallthrough
CT: control target
= control target key end

     0   :  { %v1301_v2 = vmov 0   ;;  %v1302_v10 = vmov 0.0|0.0   ;;  %vm1303_vm0 = vmmov 0   ;;  %v1304_v22 = vmov 0.0   ;;  %s1531_s0 = inlined_call_operand.vmem [shape: s32[64,1], index: 0, kind: input, shape index: {}]   ;;  %s1532_s1 = inlined_call_operand.vmem [shape: f32[128,32], index: 1, kind: input, shape index: {}]   ;;  %s1533_s2 = inlined_call_operand.vmem [shape: f32[32,32], index: 2, kind: input, shape index: {}]   ;;  %s1534_s3 = inlined_call_operand.vmem [shape: f32[1,32], index: 3, kind: input, shape index: {}]   ;;  %s1535_s4 = inlined_call_operand.vmem [shape: f32[32,128], index: 4, kind: input, shape index: {}]   ;;  %s1536_s5 = inlined_call_operand.vmem [shape: f32[1,128], index: 5, kind: input, shape index: {}]   ;;  %s1537_s6 = inlined_call_operand.hbm [shape: f32[8,128], index: 6, kind: output, shape index: {}]  }
   0x1   :  { %v24_v0 = vld [vmem:[%s1531_s0] sm:$0xff]  ;;  %v26_v1 = vld [vmem:[%s1531_s0 + $0x10] sm:$0xff]  ;;  %1255 = vset.pattern.permute.xlu0 %v1301_v2  ;;  %1256 = vset.pattern.permute.xlu1 %v1301_v2  ;;  %v25_v3 = vld [vmem:[%s1531_s0 + $0x8] sm:$0xff] }
   0x2   :  { %35 = vperm.xlu0 %1255, %v24_v0   ;;  %41 = vperm.xlu1 %1256, %v26_v1   ;;  %v82_v4 = vld [vmem:[%s1532_s1] sm:$0xff]  ;;  %v83_v5 = vld [vmem:[%s1532_s1 + $0x8] sm:$0xff]  ;;  %v27_v6 = vld [vmem:[%s1531_s0 + $0x18] sm:$0xff] }
   0x3   :  { %v1163_v7 = vpack.c.bf16 %v83_v5, %v82_v4  ;;  %v84_v8 = vld [vmem:[%s1532_s1 + $0x10] sm:$0xff]  ;;  %v85_v9 = vld [vmem:[%s1532_s1 + $0x18] sm:$0xff]  ;;  %1195 = vmatprep.subr.bf16.mxu1 %v1302_v10  ;;  %v86_v12 = vld [vmem:[%s1532_s1 + $0x20] sm:$0xff]  ;;  %1072 = vmatprep.mubr.msk.f32.mxu1 %vm1303_vm0, %v1304_v22 }
   0x4   :  { %v1167_v11 = vpack.c.bf16 %v85_v9, %v84_v8  ;;  %v87_v13 = vld [vmem:[%s1532_s1 + $0x28] sm:$0xff]  ;;  %v28_v14 = vld [vmem:[%s1531_s0 + $0x20] sm:$0xff]  ;;  %v212_v20 = vld [vmem:[%s1533_s2 + $0x10] sm:$0xff] }
   0x5   :  { %1164 = vmatprep.subr.bf16.mxu0 %v1163_v7  ;;  %v29_v15 = vld [vmem:[%s1531_s0 + $0x28] sm:$0xff]  ;;  %v210_v16 = vld [vmem:[%s1533_s2] sm:$0xff]  ;;  %v1171_v18 = vpack.c.bf16 %v87_v13, %v86_v12  ;;  %v213_v21 = vld [vmem:[%s1533_s2 + $0x18] sm:$0xff] }
   0x6   :  { %38 = vperm.xlu0 %1255, %v25_v3   ;;  %44 = vperm.xlu1 %1256, %v27_v6   ;;  %v211_v17 = vld [vmem:[%s1533_s2 + $0x8] sm:$0xff]  ;;  %v88_v23 = vld [vmem:[%s1532_s1 + $0x30] sm:$0xff]  ;;  %v89_v24 = vld [vmem:[%s1532_s1 + $0x38] sm:$0xff] }
   0x7   :  { %1166 = vmatpush3.bf16.msra.mxu0 %v1163_v7  ;;  %v1385_v19 = vpack.c.bf16 %v211_v17, %v210_v16 }
   0x8   :  { %1168 = vmatprep.subr.bf16.mxu0 %v1167_v11 }
   0x9   :  { %11 = vsyncpa [#allocation3], 0  ;;  %v30_v25 = vld [vmem:[%s1531_s0 + $0x30] sm:$0xff]  ;;  %1197 = vmatpush3.bf16.msra.mxu1 %v1385_v19  ;;  %v1405_v26 = vpack.c.bf16 %v213_v21, %v212_v20  ;;  %v1175_v27 = vpack.c.bf16 %v89_v24, %v88_v23  ;;  %v90_v28 = vld [vmem:[%s1532_s1 + $0x40] sm:$0xff]  ;;  %v32_v40 = vlaneseq  ;;  %v1305_v44 = vmov 1.0  }
   0xa   :  { %47 = vperm.xlu0 %1255, %v28_v14   ;;  %50 = vperm.xlu1 %1256, %v29_v15   ;;  %v91_v29 = vld [vmem:[%s1532_s1 + $0x48] sm:$0xff]  ;;  %v92_v31 = vld [vmem:[%s1532_s1 + $0x50] sm:$0xff]  ;;  %v93_v32 = vld [vmem:[%s1532_s1 + $0x58] sm:$0xff]  ;;  %vm214_vm8 = vcmask 261120  }
   0xb   :  { %1170 = vmatpush3.bf16.msra.mxu0 %v1167_v11  ;;  %1198 = vmatprep.subr.bf16.mxu1 %v1302_v10  ;;  %v1179_v30 = vpack.c.bf16 %v91_v29, %v90_v28  ;;  %v1183_v33 = vpack.c.bf16 %v93_v32, %v92_v31  ;;  %v94_v34 = vld [vmem:[%s1532_s1 + $0x60] sm:$0xff]  ;;  %v95_v35 = vld [vmem:[%s1532_s1 + $0x68] sm:$0xff]  ;;  %v96_v37 = vld [vmem:[%s1532_s1 + $0x70] sm:$0xff]  ;;  %v33_v41 = vand.u32 127, %v32_v40 }
   0xc   :  { %1172 = vmatprep.subr.bf16.mxu0 %v1171_v18  ;;  %v1187_v36 = vpack.c.bf16 %v95_v35, %v94_v34  ;;  %v97_v38 = vld [vmem:[%s1532_s1 + $0x78] sm:$0xff]  ;;  %v1452_v53 = vld [vmem:[%s1534_s3] ss:$0 sm:$0xff]  ;;  %v816_v35 = vld [vmem:[%s1535_s4 + $0x8] sm:$0xff] }
   0xd   :  { %1200 = vmatpush3.bf16.msra.mxu1 %v1405_v26  ;;  %v1191_v39 = vpack.c.bf16 %v97_v38, %v96_v37  ;;  %v31_v52 = vld [vmem:[%s1531_s0 + $0x38] sm:$0xff] }
   0xe   :  { %53 = vperm.xlu0 %1255, %v30_v25   ;;  %1201 = vmatprep.subr.bf16.mxu1 %v1302_v10  ;;  %v818_v37 = vld [vmem:[%s1535_s4 + $0x18] sm:$0xff] }
   0xf   :  { %1174 = vmatpush3.bf16.msra.mxu0 %v1171_v18  ;;  %56 = vperm.xlu1 %1256, %v31_v52  }
  0x10   :  { %1176 = vmatprep.subr.bf16.mxu0 %v1175_v27  ;;  %1073 = vmatmul.mubr.f32.vlgmr.msra.gmra.mrb[0].mxu1 %v1304_v22 }
  0x11   :  { %1203 = vmatpush3.bf16.msra.mxu1 %v1385_v19  ;;  %1083 = vmatprep.mubr.msk.f32.mxu1 %vm1303_vm0, %v1304_v22 }
  0x12   :  { %1204 = vmatprep.subr.bf16.mxu1 %v1302_v10 }
  0x13   :  { %1178 = vmatpush3.bf16.msra.mxu0 %v1175_v27 }
  0x14   :  { %1180 = vmatprep.subr.bf16.mxu0 %v1179_v30 }
  0x15   :  { %1206 = vmatpush3.bf16.msra.mxu1 %v1405_v26 }
  0x16   :  { %1207 = vmatprep.subr.bf16.mxu1 %v1302_v10 }
  0x17   :  { %1182 = vmatpush3.bf16.msra.mxu0 %v1179_v30 }
  0x18   :  { %1184 = vmatprep.subr.bf16.mxu0 %v1183_v33 }
  0x1b   :  { %1186 = vmatpush3.bf16.msra.mxu0 %v1183_v33 }
  0x1c   :  { %1188 = vmatprep.subr.bf16.mxu0 %v1187_v36 }
  0x1f   :  { %1190 = vmatpush3.bf16.msra.mxu0 %v1187_v36 }
  0x20   :  { %1192 = vmatprep.subr.bf16.mxu0 %v1191_v39 }
  0x23   :  { %1194 = vmatpush3.bf16.msra.mxu0 %v1191_v39 }
  0x24   :  { %1225 = vmatprep.subr.bf16.mxu0 %v1302_v10 }
  0x81   :  { %v36_v42 = vpop.permute.xlu0 %35  ;;  %v42_v43 = vpop.permute.xlu1 %41 }
  0x82   :  { %vm58_vm1 = vcmp.eq.s32.totalorder %v33_v41, %v36_v42  ;;  %vm60_vm2 = vcmp.eq.s32.totalorder %v33_v41, %v42_v43 }
  0x83   :  { %1052 = vmatprep.mubr.msk.f32.mxu0 %vm58_vm1, %v1305_v44 }
  0x85   :  { %v39_v45 = vpop.permute.xlu0 %38  ;;  %v45_v46 = vpop.permute.xlu1 %44 }
  0x86   :  { %vm59_vm3 = vcmp.eq.s32.totalorder %v33_v41, %v39_v45  ;;  %vm61_vm4 = vcmp.eq.s32.totalorder %v33_v41, %v45_v46 }
  0x87   :  { %1053 = vmatmul.mubr.msk.f32.vlgmr.msra.gmra.mrb[0].mxu0 %vm59_vm3, %v1305_v44 }
  0x88   :  { %1055 = vmatprep.mubr.msk.f32.mxu0 %vm60_vm2, %v1305_v44  ;;  %1227 = vmatpush3.bf16.msra.mxu0 %v1385_v19 }
  0x89   :  { %v48_v47 = vpop.permute.xlu0 %47  ;;  %v51_v48 = vpop.permute.xlu1 %50  ;;  %1228 = vmatprep.subr.bf16.mxu0 %v1302_v10 }
  0x8a   :  { %vm62_vm5 = vcmp.eq.s32.totalorder %v33_v41, %v48_v47  ;;  %vm63_vm6 = vcmp.eq.s32.totalorder %v33_v41, %v51_v48 }
  0x8b   :  { %1056 = vmatmul.mubr.msk.f32.gmra.mrb[2].mxu0 %vm61_vm4, %v1305_v44 }
  0x8c   :  { %1058 = vmatprep.mubr.msk.f32.mxu0 %vm62_vm5, %v1305_v44  ;;  %1230 = vmatpush3.bf16.msra.mxu0 %v1405_v26 }
  0x8d   :  { %v54_v49 = vpop.permute.xlu0 %53  ;;  %1237 = vmatprep.subr.bf16.mxu0 %v1302_v10 }
  0x8e   :  { %vm64_vm7 = vcmp.eq.s32.totalorder %v33_v41, %v54_v49  ;;  %v57_v59 = vpop.permute.xlu1 %56 }
  0x8f   :  { %1059 = vmatmul.mubr.msk.f32.gmra.mrb[4].mxu0 %vm63_vm6, %v1305_v44  ;;  %vm65_vm9 = vcmp.eq.s32.totalorder %v33_v41, %v57_v59 }
  0x90   :  { %1061 = vmatprep.mubr.msk.f32.mxu0 %vm64_vm7, %v1305_v44 }
  0x93   :  { %1062 = vmatmul.mubr.msk.f32.gmra.mrb[6].mxu0 %vm65_vm9, %v1305_v44  ;;  %v949_v44 = vld [vmem:[%s1536_s5] ss:$0 sm:$0xff] }
  0x94   :  { %1127 = vmatprep.mubr.msk.f32.mxu0 %vm1303_vm0, %v1304_v22 }
  0xe3   :  { %v284_v50 = vpop.f32.mrb[0].mxu1 }
  0xe4   :  { %v1074_v51 = vpop.f32.mrb[1].mxu1 }
 0x15a   :  { %v1054_v54 = vpop.f32.mrb[0].mxu0 }
 0x15b   :  { %v171_v55 = vpop.f32.mrb[1].mxu0  ;;  %v177_v0 = vadd.f32 %v1054_v54, %v1452_v53 }
 0x15c   :  { %v172_v56 = vadd.f32 %v1452_v53, %v171_v55 }
 0x15e   :  { %v288_v57 = vadd.f32 %v284_v50, %v172_v56  ;;  %v1057_v60 = vpop.f32.mrb[2].mxu0 }
 0x15f   :  { %v181_v61 = vpop.f32.mrb[3].mxu0  ;;  %v187_v13 = vadd.f32 %v1057_v60, %v1452_v53 }
 0x160   :  { %1257 = vtanh.f32 %v288_v57  ;;  %v182_v7 = vadd.f32 %v1452_v53, %v181_v61 }
 0x162   :  { %v1060_v62 = vpop.f32.mrb[4].mxu0 }
 0x163   :  { %v191_v63 = vpop.f32.mrb[5].mxu0  ;;  %v197_v25 = vadd.f32 %v1060_v62, %v1452_v53 }
 0x164   :  { %v192_v18 = vadd.f32 %v1452_v53, %v191_v63 }
 0x166   :  { %v1063_v5 = vpop.f32.mrb[6].mxu0 }
 0x167   :  { %v201_v6 = vpop.f32.mrb[7].mxu0  ;;  %v207_v39 = vadd.f32 %v1063_v5, %v1452_v53 }
 0x16a   :  { %v1258_v58 = vpop.eup %1257 }
 0x16b   :  { %1084 = vmatmul.mubr.msk.f32.vlgmr.msra.gmra.mrb[2].mxu1 %vm214_vm8, %v1258_v58 }
 0x16c   :  { %1209 = vmatpush3.bf16.msra.mxu1 %v1385_v19  ;;  %1094 = vmatprep.mubr.msk.f32.mxu1 %vm1303_vm0, %v1304_v22 }
 0x16d   :  { %1210 = vmatprep.subr.bf16.mxu1 %v1302_v10 }
 0x170   :  { %1212 = vmatpush3.bf16.msra.mxu1 %v1405_v26 }
 0x171   :  { %1213 = vmatprep.subr.bf16.mxu1 %v1302_v10 }
 0x23e   :  { %v359_v1 = vpop.f32.mrb[2].mxu1 }
 0x23f   :  { %v363_v2 = vadd.f32 %v359_v1, %v177_v0  ;;  %v1085_v3 = vpop.f32.mrb[3].mxu1 }
 0x241   :  { %1259 = vtanh.f32 %v363_v2 }
 0x24b   :  { %v1260_v4 = vpop.eup %1259 }
 0x24c   :  { %1095 = vmatmul.mubr.msk.f32.vlgmr.msra.gmra.mrb[4].mxu1 %vm214_vm8, %v1260_v4 }
 0x24d   :  { %1215 = vmatpush3.bf16.msra.mxu1 %v1385_v19  ;;  %1105 = vmatprep.mubr.msk.f32.mxu1 %vm1303_vm0, %v1304_v22 }
 0x24e   :  { %1216 = vmatprep.subr.bf16.mxu1 %v1302_v10 }
 0x251   :  { %1218 = vmatpush3.bf16.msra.mxu1 %v1405_v26 }
 0x252   :  { %1219 = vmatprep.subr.bf16.mxu1 %v1302_v10 }
 0x31f   :  { %v434_v8 = vpop.f32.mrb[4].mxu1 }
 0x320   :  { %v438_v9 = vadd.f32 %v434_v8, %v182_v7  ;;  %v1096_v11 = vpop.f32.mrb[5].mxu1 }
 0x322   :  { %1261 = vtanh.f32 %v438_v9 }
 0x32c   :  { %v1262_v12 = vpop.eup %1261 }
 0x32d   :  { %1106 = vmatmul.mubr.msk.f32.vlgmr.msra.gmra.mrb[6].mxu1 %vm214_vm8, %v1262_v12 }
 0x32e   :  { %1221 = vmatpush3.bf16.msra.mxu1 %v1385_v19  ;;  %1116 = vmatprep.mubr.msk.f32.mxu1 %vm1303_vm0, %v1304_v22 }
 0x32f   :  { %1222 = vmatprep.subr.bf16.mxu1 %v1302_v10 }
 0x332   :  { %1224 = vmatpush3.bf16.msra.mxu1 %v1405_v26 }
 0x333   :  { %1231 = vmatprep.subr.bf16.mxu1 %v1302_v10 }
 0x400   :  { %v509_v14 = vpop.f32.mrb[6].mxu1 }
 0x401   :  { %v513_v15 = vadd.f32 %v509_v14, %v187_v13  ;;  %v1107_v16 = vpop.f32.mrb[7].mxu1 }
 0x403   :  { %1263 = vtanh.f32 %v513_v15 }
 0x40d   :  { %v1264_v17 = vpop.eup %1263 }
 0x40e   :  { %1117 = vmatmul.mubr.msk.f32.vlgmr.msra.gmra.mrb[8].mxu1 %vm214_vm8, %v1264_v17 }
 0x40f   :  { %1233 = vmatpush3.bf16.msra.mxu1 %v1385_v19  ;;  %1138 = vmatprep.mubr.msk.f32.mxu1 %vm1303_vm0, %v1304_v22 }
 0x410   :  { %1234 = vmatprep.subr.bf16.mxu1 %v1302_v10 }
 0x413   :  { %1236 = vmatpush3.bf16.msra.mxu1 %v1405_v26 }
 0x414   :  { %1243 = vmatprep.subr.bf16.mxu1 %v1302_v10 }
 0x4e1   :  { %v584_v20 = vpop.f32.mrb[8].mxu1 }
 0x4e2   :  { %v588_v21 = vadd.f32 %v584_v20, %v192_v18  ;;  %v1118_v23 = vpop.f32.mrb[9].mxu1 }
 0x4e4   :  { %1265 = vtanh.f32 %v588_v21 }
 0x4ee   :  { %v1266_v24 = vpop.eup %1265 }
 0x4ef   :  { %1128 = vmatmul.mubr.msk.f32.vlgmr.msra.gmra.mrb[8].mxu0 %vm214_vm8, %v1266_v24 }
 0x4f0   :  { %1239 = vmatpush3.bf16.msra.mxu0 %v1385_v19  ;;  %1149 = vmatprep.mubr.msk.f32.mxu0 %vm1303_vm0, %v1304_v22  ;;  %v202_v19 = vadd.f32 %v1452_v53, %v201_v6 }
 0x4f1   :  { %1240 = vmatprep.subr.bf16.mxu0 %v1302_v10 }
 0x4f4   :  { %1242 = vmatpush3.bf16.msra.mxu0 %v1405_v26  ;;  %v815_v26 = vld [vmem:[%s1535_s4] sm:$0xff] }
 0x4f5   :  { %v1244_v36 = vpack.c.bf16 %v816_v35, %v815_v26 }
 0x5c2   :  { %v659_v27 = vpop.f32.mrb[8].mxu0 }
 0x5c3   :  { %v663_v28 = vadd.f32 %v659_v27, %v197_v25  ;;  %v1129_v29 = vpop.f32.mrb[9].mxu0 }
 0x5c5   :  { %1267 = vtanh.f32 %v663_v28 }
 0x5cf   :  { %v1268_v30 = vpop.eup %1267 }
 0x5d0   :  { %1139 = vmatmul.mubr.msk.f32.vlgmr.msra.gmra.mrb[10].mxu1 %vm214_vm8, %v1268_v30 }
 0x5d1   :  { %1160 = vmatprep.mubr.msk.f32.mxu1 %vm1303_vm0, %v1304_v22  ;;  %v817_v22 = vld [vmem:[%s1535_s4 + $0x10] sm:$0xff]  ;;  %1245 = vmatpush3.bf16.msra.mxu1 %v1244_v36  ;;  %s1306_s4 = smov [#allocation2]  }
 0x5d2   :  { %v1247_v38 = vpack.c.bf16 %v818_v37, %v817_v22  ;;  %1246 = vmatprep.subr.bf16.mxu1 %v1302_v10  ;;  %s917_s12 = sshll.u32 %s1306_s4, 4  ;;  %s918_s12 = int_to_ptr.vmem [resolvable:$true] %s917_s12 }
 0x5d3   :  { %s1277_s5 = scalar_lea.vmem %s918_s12, 128  ;;  %p1282_p1 = scmp.lt.s32.totalorder %s918_s12, %s918_s12 }
 0x5d4   :  { %p1278_p0 = scmp.ne.s32.totalorder %s918_s12, %s1277_s5  ;;  %p1283_p2 = scmp.lt.s32.totalorder %s1277_s5, %s1277_s5 }
 0x5d5   :  { %1248 = vmatpush3.bf16.msra.mxu1 %v1247_v38 }
 0x5d6   :  { %p1284_p3 = por %p1283_p2, %p1282_p1 }
 0x5d8   :  { %p1285_p4 = pnand %p1284_p3, %p1278_p0 }
 0x6a3   :  { %v734_v31 = vpop.f32.mrb[10].mxu1 }
 0x6a4   :  { %v738_v32 = vadd.f32 %v734_v31, %v202_v19  ;;  %v1140_v33 = vpop.f32.mrb[11].mxu1 }
 0x6a6   :  { %1269 = vtanh.f32 %v738_v32 }
 0x6b0   :  { %v1270_v34 = vpop.eup %1269 }
 0x6b1   :  { %1150 = vmatmul.mubr.msk.f32.vlgmr.msra.gmra.mrb[10].mxu0 %vm214_vm8, %v1270_v34 }
 0x784   :  { %v809_v40 = vpop.f32.mrb[10].mxu0 }
 0x785   :  { %v813_v41 = vadd.f32 %v809_v40, %v207_v39  ;;  %v1151_v42 = vpop.f32.mrb[11].mxu0 }
 0x787   :  { %1271 = vtanh.f32 %v813_v41 }
 0x791   :  { %v1272_v43 = vpop.eup %1271 }
 0x792   :  { %1161 = vmatmul.mubr.msk.f32.vlgmr.msra.gmra.mrb[12].mxu1 %vm214_vm8, %v1272_v43 }
 0x865   :  { %v895_v45 = vpop.f32.mrb[12].mxu1 }
 0x866   :  { %v896_v46 = vadd.f32 %v949_v44, %v895_v45  ;;  %v1162_v47 = vpop.f32.mrb[13].mxu1 }
 0x868   :  { %899 = vmax.xlane.f32.xlu0 %v896_v46 }
 0x8f5   :  { %v900_v48 = vpop.xlane.xlu0 %899 }
 0x8f6   :  { %v901_v10 = vsub.f32 %v896_v46, %v900_v48 }
 0x8f8   :  { %v902_v49 = vmul.f32 1.442695, %v901_v10 }
 0x8fa   :  { %1273 = vpow2.f32 %v902_v49 }
 0x904   :  { %v1274_v50 = vpop.eup %1273 }
 0x905   :  { %904 = vadd.xlane.f32.xlu1 %v1274_v50 }
 0x992   :  { %v905_v51 = vpop.xlane.xlu1 %904 }
 0x993   :  { %1275 = vlog2.f32 %v905_v51 }
 0x99d   :  { %v1276_v52 = vpop.eup %1275 }
 0x99e   :  { %v907_v53 = vmul.f32 0.6931472, %v1276_v52 }
 0x9a0   :  { %v908_v54 = vadd.f32 %v907_v53, %v900_v48 }
 0x9a2   :  { %v909_v55 = vsub.f32 %v896_v46, %v908_v54 }
 0x9a4   :  { %910 = vst [vmem:[#allocation2] sm:$0xff] %v909_v55 }
 0x9a5   :  { %1288 = shalt.err (!%p1285_p4)
}
 0x9a6   :  { %s1289_s15 = scalar_lea.hbm %s1537_s6, 128 }
 0x9a7   :  { %p1290_p5 = scmp.ne.s32.totalorder %s1537_s6, %s1289_s15  ;;  %p1293_p6 = scmp.lt.u32.totalorder %s1289_s15, %s1537_s6 }
 0x9a9   :  { %p1295_p7 = pnand %p1293_p6, %p1290_p5 }
 0x9ab   :  { %1298 = shalt.err (!%p1295_p7)
}
 0x9ac   :  { %920 = dma.vmem_to_hbm [thread:$0]  %s918_s12, 128, %s1537_s6, [#allocation3]  }
 0x9ad   :  { %1299 = dma.done.wait [#allocation3], 128  }
 0x9ae   :  { %1300 = vsyncadd [#allocation3], 4294967168 }
 0x9af   :  { %924 = vsyncpa [#allocation3], 1 }

</bundles_post_ra>
